<compile_context>
chip_gen: v6e
topology: v6e:2x2x1
jax: 0.10.0
libtpu: 0.0.40
codegen_flags: <defaults>
</compile_context>

<pallas_src>
import functools

import jax
import jax.numpy as jnp
from jax import lax
from jax.experimental import pallas as pl
from jax.experimental.pallas import tpu as pltpu


def _merge_conv_kernel(x1_ref, x2_ref, w1_ref, w2_ref, w3_ref, b_ref, o_ref, *, H):
    """conv1x1 -> conv3x3(SAME) -> conv1x1, each + folded-BN bias + ReLU.

    Activations stay lane-dense (rows, W*C) the whole time:
      rows  = images_in_block * H          (sublane axis)
      lanes = w * C + c                    (lane axis)
    1x1 convs: matmuls vs block-diagonal weights.  3x3 conv: dx + channel
    mixing folded into banded weights (one per dy); dy handled by a sublane
    roll + image-boundary row mask.  No in-kernel reshapes / lane concats.
    """
    R = x1_ref.shape[0]
    LC1 = w2_ref.shape[1]          # W * C1
    LC2 = w3_ref.shape[1]          # W * C2
    b = b_ref[...]                 # (3, LC1) f32 packed biases

    # ---- conv1 (1x1): channel concat of the two embeds == sum of 2 matmuls ----
    a1 = jnp.dot(x1_ref[...], w1_ref[0], preferred_element_type=jnp.float32)
    a1 = a1 + jnp.dot(x2_ref[...], w1_ref[1], preferred_element_type=jnp.float32)
    y1 = jnp.maximum(a1 + b[0:1, :], 0.0)                        # (R, LC1) f32
    y1b = y1.astype(jnp.bfloat16)

    # ---- conv2 (3x3, pad=1): dy = sublane roll + row mask; dx is in the weights ----
    row = lax.broadcasted_iota(jnp.int32, (R, LC1), 0) % H
    # dy=0 window: source row h-1  -> roll down by 1, zero first row of each image
    up = jnp.where(row == 0, 0.0,
                   pltpu.roll(y1, shift=1, axis=0)).astype(jnp.bfloat16)
    # dy=2 window: source row h+1  -> roll up by 1, zero last row of each image
    dn = jnp.where(row == H - 1, 0.0,
                   pltpu.roll(y1, shift=R - 1, axis=0)).astype(jnp.bfloat16)
    a2 = jnp.dot(up, w2_ref[0], preferred_element_type=jnp.float32)
    a2 = a2 + jnp.dot(y1b, w2_ref[1], preferred_element_type=jnp.float32)
    a2 = a2 + jnp.dot(dn, w2_ref[2], preferred_element_type=jnp.float32)
    y2 = jnp.maximum(a2 + b[1:2, :], 0.0)                        # (R, LC1) f32

    # ---- conv3 (1x1) ----
    a3 = jnp.dot(y2.astype(jnp.bfloat16), w3_ref[...],
                 preferred_element_type=jnp.float32)
    y3 = jnp.maximum(a3 + b[2:3, :LC2], 0.0)                     # (R, LC2) f32

    o_ref[...] = y3.astype(o_ref.dtype)


def merge_forward(pixel_embed1, pixel_embed2, params, *, in_dim, patch_size,
                  n_blocks=1):
    """Weight packing + Pallas conv stack.  Returns NHWC (B, H, W, out_dim).

    n_blocks=1: whole batch in one block (v5e / v6e).
    n_blocks=2: two 'parallel' grid steps, one per v7x TensorCore.
    """
    Hp = Wp = patch_size
    W_col = pixel_embed1.shape[1]
    BW_col, H_row, _ = pixel_embed2.shape
    B = BW_col // W_col
    assert H_row == W_col
    H, W = H_row * Hp, W_col * Wp

    w1, s1, t1, w2, s2, t2, w3, s3, t3 = params
    C0, C1 = w1.shape
    C2 = w3.shape[1]
    assert C0 == 2 * in_dim
    LC1, LC2 = W * C1, W * C2      # 256 / 128 here: lane-dense (multiples of 128)

    # ---- host-side packing: BN scale folded in f32, then bf16 for the MXU ----
    f32, bf = jnp.float32, jnp.bfloat16
    eyeW = jnp.eye(W, dtype=f32)
    w1s = w1 * s1                                                # (C0, C1)
    w1p = jnp.stack([jnp.kron(eyeW, w1s[:in_dim]),               # embed-1 half
                     jnp.kron(eyeW, w1s[in_dim:])]).astype(bf)   # (2, W*in, LC1)
    w2s = w2 * s2                                                # (3,3,C1,C1) HWIO
    w2p = jnp.stack([
        sum(jnp.kron(jnp.eye(W, W, k=1 - dx, dtype=f32), w2s[dy, dx])
            for dx in range(3))
        for dy in range(3)]).astype(bf)                          # (3, LC1, LC1)
    w3p = jnp.kron(eyeW, w3 * s3).astype(bf)                     # (LC1, LC2)

    bp = jnp.zeros((3, LC1), f32)                                # packed biases
    bp = bp.at[0, :].set(jnp.tile(t1[0], W))
    bp = bp.at[1, :].set(jnp.tile(t2[0], W))
    bp = bp.at[2, :LC2].set(jnp.tile(t3[0], W))

    # ---- inputs: un-patchify each embed to (B*H, W*in_dim); NO channel concat ----
    def to_rows(pe):
        t = pe.reshape(B, H_row, W_col, Hp, Wp, in_dim)
        t = t.transpose(0, 1, 3, 2, 4, 5)          # (B, H_row, Hp, W_col, Wp, Cin)
        return t.reshape(B * H, W * in_dim).astype(bf)

    x1, x2 = to_rows(pixel_embed1), to_rows(pixel_embed2)

    assert B % n_blocks == 0
    R = (B // n_blocks) * H                                      # rows per block

    const = lambda i: (0, 0)
    out2d = pl.pallas_call(
        functools.partial(_merge_conv_kernel, H=H),
        out_shape=jax.ShapeDtypeStruct((B * H, LC2), jnp.float32),
        grid_spec=pltpu.PrefetchScalarGridSpec(
            num_scalar_prefetch=0,
            grid=(n_blocks,),
            in_specs=[
                pl.BlockSpec((R, W * in_dim), lambda i: (i, 0)),
                pl.BlockSpec((R, W * in_dim), lambda i: (i, 0)),
                pl.BlockSpec((2, W * in_dim, LC1), lambda i: (0, 0, 0)),
                pl.BlockSpec((3, LC1, LC1), lambda i: (0, 0, 0)),
                pl.BlockSpec((LC1, LC2), const),
                pl.BlockSpec((3, LC1), const),
            ],
            out_specs=pl.BlockSpec((R, LC2), lambda i: (i, 0)),
        ),
        compiler_params=pltpu.CompilerParams(dimension_semantics=("parallel",)),
    )(x1, x2, w1p, w2p, w3p, bp)
    return out2d.reshape(B, H, W, C2)


def _make_conv_bn_params(key, ci, co, ksize, eps=1e-5):
    """Deterministic conv weight + eval-mode BN folded into (scale, bias)."""
    kw, kb, kg, kbeta = jax.random.split(key, 4)
    if ksize == 1:
        w = 0.1 * jax.random.normal(kw, (ci, co), jnp.float32)
    else:
        w = 0.1 * jax.random.normal(kw, (ksize, ksize, ci, co), jnp.float32)
    conv_b = 0.1 * jax.random.normal(kb, (co,), jnp.float32)
    gamma = 1.0 + 0.1 * jax.random.normal(kg, (co,), jnp.float32)
    beta = 0.1 * jax.random.normal(kbeta, (co,), jnp.float32)
    run_mean = jnp.zeros((co,), jnp.float32)
    run_var = jnp.ones((co,), jnp.float32)
    scale = gamma / jnp.sqrt(run_var + eps)
    bias = beta + (conv_b - run_mean) * scale
    return w, scale.reshape(1, co), bias.reshape(1, co)


if __name__ == "__main__":
    # Small shapes consistent with Merge: in_dim=4, out_dim=8, patch_size=4,
    # H_row = W_column = 4, B = 2  ->  merged image is (2, 16, 16, 8) NHWC.
    in_dim, out_dim, patch_size = 4, 8, 4
    B, N = 2, 4                       # N = H_row = W_column
    Hp = Wp = patch_size
    C0, C1, C2 = 2 * in_dim, 4 * in_dim, out_dim

    key = jax.random.PRNGKey(0)
    k_pe1, k_pe2, k_c1, k_c2, k_c3 = jax.random.split(key, 5)

    pixel_embed1 = jax.random.normal(k_pe1, (B * N, N, Hp * Wp * in_dim), jnp.float32)
    pixel_embed2 = jax.random.normal(k_pe2, (B * N, N, Hp * Wp * in_dim), jnp.float32)

    w1, s1, t1 = _make_conv_bn_params(k_c1, C0, C1, 1)
    w2, s2, t2 = _make_conv_bn_params(k_c2, C1, C1, 3)
    w3, s3, t3 = _make_conv_bn_params(k_c3, C1, C2, 1)
    params = (w1, s1, t1, w2, s2, t2, w3, s3, t3)

    out = merge_forward(pixel_embed1, pixel_embed2, params,
                        in_dim=in_dim, patch_size=patch_size, n_blocks=1)
    out = jax.block_until_ready(out)

    # Pure-JAX reference with the same precision policy as the kernel
    # (BN scale folded into weights in f32 -> bf16 MXU operands, f32 accum,
    # bias + ReLU in f32).  Conv path is independent of the kernel's
    # block-diagonal / banded weight packing.
    def to_nhwc(pe):
        t = pe.reshape(B, N, N, Hp, Wp, in_dim).transpose(0, 1, 3, 2, 4, 5)
        return t.reshape(B, N * Hp, N * Wp, in_dim)

    bf = jnp.bfloat16
    w1s, w2s, w3s = w1 * s1, w2 * s2, w3 * s3
    img = jnp.concatenate([to_nhwc(pixel_embed1), to_nhwc(pixel_embed2)], axis=-1)
    r1 = jnp.einsum("bhwc,cd->bhwd", img.astype(bf), w1s.astype(bf),
                    preferred_element_type=jnp.float32)
    r1 = jnp.maximum(r1 + t1, 0.0)
    r2 = lax.conv_general_dilated(r1.astype(bf), w2s.astype(bf), (1, 1), "SAME",
                                  dimension_numbers=("NHWC", "HWIO", "NHWC"),
                                  preferred_element_type=jnp.float32)
    r2 = jnp.maximum(r2 + t2, 0.0)
    r3 = jnp.einsum("bhwc,cd->bhwd", r2.astype(bf), w3s.astype(bf),
                    preferred_element_type=jnp.float32)
    r3 = jnp.maximum(r3 + t3, 0.0)

    assert out.shape == (B, N * Hp, N * Wp, out_dim)
    assert jnp.allclose(out, r3, rtol=5e-3, atol=5e-3), "Pallas kernel mismatch vs reference"
    print("KERNEL_OK")
</pallas_src>

<mosaic_0001>
module attributes {stable_mosaic.version = 11 : i64} {
  func.func @_merge_conv_kernel(%arg0: i32, %arg1: memref<32x64xbf16, #tpu.memory_space<vmem>>, %arg2: memref<32x64xbf16, #tpu.memory_space<vmem>>, %arg3: memref<2x64x256xbf16, #tpu.memory_space<vmem>>, %arg4: memref<3x256x256xbf16, #tpu.memory_space<vmem>>, %arg5: memref<256x128xbf16, #tpu.memory_space<vmem>>, %arg6: memref<3x256xf32, #tpu.memory_space<vmem>>, %arg7: memref<32x128xf32, #tpu.memory_space<vmem>>) attributes {dimension_semantics = [#tpu.dimension_semantics<parallel>], iteration_bounds = array<i64: 1>, scalar_prefetch = 0 : i64, scratch_operands = 0 : i64, tpu.core_type = #tpu.core_type<tc>, window_params = [{transform_indices = @transform_0, window_bounds = array<i64: 32, 64>}, {transform_indices = @transform_1, window_bounds = array<i64: 32, 64>}, {pipeline_mode = #tpu.pipeline_mode<synchronous>, transform_indices = @transform_2, window_bounds = array<i64: 2, 64, 256>}, {pipeline_mode = #tpu.pipeline_mode<synchronous>, transform_indices = @transform_3, window_bounds = array<i64: 3, 256, 256>}, {pipeline_mode = #tpu.pipeline_mode<synchronous>, transform_indices = @transform_4, window_bounds = array<i64: 256, 128>}, {pipeline_mode = #tpu.pipeline_mode<synchronous>, transform_indices = @transform_5, window_bounds = array<i64: 3, 256>}, {transform_indices = @transform_6, window_bounds = array<i64: 32, 128>}]} {
    %c0 = arith.constant 0 : index
    %c0_0 = arith.constant 0 : index
    %0 = vector.load %arg6[%c0, %c0_0] : memref<3x256xf32, #tpu.memory_space<vmem>>, vector<3x256xf32>
    %c0_1 = arith.constant 0 : index
    %c0_2 = arith.constant 0 : index
    %1 = vector.load %arg1[%c0_1, %c0_2] : memref<32x64xbf16, #tpu.memory_space<vmem>>, vector<32x64xbf16>
    %c0_3 = arith.constant 0 : index
    %c0_4 = arith.constant 0 : index
    %c0_5 = arith.constant 0 : index
    %2 = vector.load %arg3[%c0_3, %c0_4, %c0_5] : memref<2x64x256xbf16, #tpu.memory_space<vmem>>, vector<1x64x256xbf16>
    %3 = vector.shape_cast %2 : vector<1x64x256xbf16> to vector<64x256xbf16>
    %cst = arith.constant dense<0.000000e+00> : vector<32x256xf32>
    %4 = tpu.matmul %1, %3, %cst {dimension_numbers = #tpu.dot_dimension_numbers<[1], [0], [0], [1], [0, 0, 1, 1], [], []>} : vector<32x64xbf16>, vector<64x256xbf16>, vector<32x256xf32> -> vector<32x256xf32>
    %c0_6 = arith.constant 0 : index
    %c0_7 = arith.constant 0 : index
    %5 = vector.load %arg2[%c0_6, %c0_7] : memref<32x64xbf16, #tpu.memory_space<vmem>>, vector<32x64xbf16>
    %c1 = arith.constant 1 : index
    %c0_8 = arith.constant 0 : index
    %c0_9 = arith.constant 0 : index
    %6 = vector.load %arg3[%c1, %c0_8, %c0_9] : memref<2x64x256xbf16, #tpu.memory_space<vmem>>, vector<1x64x256xbf16>
    %7 = vector.shape_cast %6 : vector<1x64x256xbf16> to vector<64x256xbf16>
    %cst_10 = arith.constant dense<0.000000e+00> : vector<32x256xf32>
    %8 = tpu.matmul %5, %7, %cst_10 {dimension_numbers = #tpu.dot_dimension_numbers<[1], [0], [0], [1], [0, 0, 1, 1], [], []>} : vector<32x64xbf16>, vector<64x256xbf16>, vector<32x256xf32> -> vector<32x256xf32>
    %9 = arith.addf %4, %8 : vector<32x256xf32>
    %10 = vector.extract_strided_slice %0 {offsets = [0, 0], sizes = [1, 256], strides = [1, 1]} : vector<3x256xf32> to vector<1x256xf32>
    %11 = vector.broadcast %10 : vector<1x256xf32> to vector<32x256xf32>
    %12 = arith.addf %9, %11 : vector<32x256xf32>
    %cst_11 = arith.constant 0.000000e+00 : f32
    %13 = vector.broadcast %cst_11 : f32 to vector<32x256xf32>
    %14 = arith.maximumf %12, %13 : vector<32x256xf32>
    %15 = arith.truncf %14 : vector<32x256xf32> to vector<32x256xbf16>
    %16 = tpu.iota {dimensions = array<i32: 0>} : vector<32x256xi32>
    %c16_i32 = arith.constant 16 : i32
    %c0_i32 = arith.constant 0 : i32
    %17 = arith.cmpi eq, %c16_i32, %c0_i32 : i32
    %c1_i32 = arith.constant 1 : i32
    %18 = arith.select %17, %c1_i32, %c16_i32 : i32
    %19 = vector.broadcast %18 : i32 to vector<32x256xi32>
    %20 = arith.remsi %16, %19 : vector<32x256xi32>
    %c0_i32_12 = arith.constant 0 : i32
    %21 = vector.broadcast %c0_i32_12 : i32 to vector<32x256xi32>
    %22 = arith.cmpi ne, %20, %21 : vector<32x256xi32>
    %c0_i32_13 = arith.constant 0 : i32
    %23 = vector.broadcast %c0_i32_13 : i32 to vector<32x256xi32>
    %24 = arith.cmpi slt, %20, %23 : vector<32x256xi32>
    %c0_i32_14 = arith.constant 0 : i32
    %25 = arith.cmpi slt, %18, %c0_i32_14 : i32
    %26 = vector.broadcast %25 : i1 to vector<32x256xi1>
    %27 = vector.broadcast %26 : vector<32x256xi1> to vector<32x256xi1>
    %28 = arith.xori %24, %27 : vector<32x256xi1>
    %29 = arith.andi %28, %22 : vector<32x256xi1>
    %30 = vector.broadcast %18 : i32 to vector<32x256xi32>
    %31 = arith.addi %20, %30 : vector<32x256xi32>
    %32 = arith.select %29, %31, %20 : vector<32x256xi1>, vector<32x256xi32>
    %c0_i32_15 = arith.constant 0 : i32
    %33 = vector.broadcast %c0_i32_15 : i32 to vector<32x256xi32>
    %34 = arith.cmpi eq, %32, %33 : vector<32x256xi32>
    %c1_i32_16 = arith.constant 1 : i32
    %35 = tpu.dynamic_rotate %14 by %c1_i32_16 dim 0 : vector<32x256xf32>, i32 -> vector<32x256xf32>
    %cst_17 = arith.constant 0.000000e+00 : f32
    %36 = vector.broadcast %cst_17 : f32 to vector<32x256xf32>
    %37 = arith.select %34, %36, %35 : vector<32x256xi1>, vector<32x256xf32>
    %38 = arith.truncf %37 : vector<32x256xf32> to vector<32x256xbf16>
    %c15_i32 = arith.constant 15 : i32
    %39 = vector.broadcast %c15_i32 : i32 to vector<32x256xi32>
    %40 = arith.cmpi eq, %32, %39 : vector<32x256xi32>
    %c31_i32 = arith.constant 31 : i32
    %41 = tpu.dynamic_rotate %14 by %c31_i32 dim 0 : vector<32x256xf32>, i32 -> vector<32x256xf32>
    %cst_18 = arith.constant 0.000000e+00 : f32
    %42 = vector.broadcast %cst_18 : f32 to vector<32x256xf32>
    %43 = arith.select %40, %42, %41 : vector<32x256xi1>, vector<32x256xf32>
    %44 = arith.truncf %43 : vector<32x256xf32> to vector<32x256xbf16>
    %c0_19 = arith.constant 0 : index
    %c0_20 = arith.constant 0 : index
    %c0_21 = arith.constant 0 : index
    %45 = vector.load %arg4[%c0_19, %c0_20, %c0_21] : memref<3x256x256xbf16, #tpu.memory_space<vmem>>, vector<1x256x256xbf16>
    %46 = vector.shape_cast %45 : vector<1x256x256xbf16> to vector<256x256xbf16>
    %cst_22 = arith.constant dense<0.000000e+00> : vector<32x256xf32>
    %47 = tpu.matmul %38, %46, %cst_22 {dimension_numbers = #tpu.dot_dimension_numbers<[1], [0], [0], [1], [0, 0, 1, 1], [], []>} : vector<32x256xbf16>, vector<256x256xbf16>, vector<32x256xf32> -> vector<32x256xf32>
    %c1_23 = arith.constant 1 : index
    %c0_24 = arith.constant 0 : index
    %c0_25 = arith.constant 0 : index
    %48 = vector.load %arg4[%c1_23, %c0_24, %c0_25] : memref<3x256x256xbf16, #tpu.memory_space<vmem>>, vector<1x256x256xbf16>
    %49 = vector.shape_cast %48 : vector<1x256x256xbf16> to vector<256x256xbf16>
    %cst_26 = arith.constant dense<0.000000e+00> : vector<32x256xf32>
    %50 = tpu.matmul %15, %49, %cst_26 {dimension_numbers = #tpu.dot_dimension_numbers<[1], [0], [0], [1], [0, 0, 1, 1], [], []>} : vector<32x256xbf16>, vector<256x256xbf16>, vector<32x256xf32> -> vector<32x256xf32>
    %51 = arith.addf %47, %50 : vector<32x256xf32>
    %c2 = arith.constant 2 : index
    %c0_27 = arith.constant 0 : index
    %c0_28 = arith.constant 0 : index
    %52 = vector.load %arg4[%c2, %c0_27, %c0_28] : memref<3x256x256xbf16, #tpu.memory_space<vmem>>, vector<1x256x256xbf16>
    %53 = vector.shape_cast %52 : vector<1x256x256xbf16> to vector<256x256xbf16>
    %cst_29 = arith.constant dense<0.000000e+00> : vector<32x256xf32>
    %54 = tpu.matmul %44, %53, %cst_29 {dimension_numbers = #tpu.dot_dimension_numbers<[1], [0], [0], [1], [0, 0, 1, 1], [], []>} : vector<32x256xbf16>, vector<256x256xbf16>, vector<32x256xf32> -> vector<32x256xf32>
    %55 = arith.addf %51, %54 : vector<32x256xf32>
    %56 = vector.extract_strided_slice %0 {offsets = [1, 0], sizes = [1, 256], strides = [1, 1]} : vector<3x256xf32> to vector<1x256xf32>
    %57 = vector.broadcast %56 : vector<1x256xf32> to vector<32x256xf32>
    %58 = arith.addf %55, %57 : vector<32x256xf32>
    %cst_30 = arith.constant 0.000000e+00 : f32
    %59 = vector.broadcast %cst_30 : f32 to vector<32x256xf32>
    %60 = arith.maximumf %58, %59 : vector<32x256xf32>
    %61 = arith.truncf %60 : vector<32x256xf32> to vector<32x256xbf16>
    %c0_31 = arith.constant 0 : index
    %c0_32 = arith.constant 0 : index
    %62 = vector.load %arg5[%c0_31, %c0_32] : memref<256x128xbf16, #tpu.memory_space<vmem>>, vector<256x128xbf16>
    %cst_33 = arith.constant dense<0.000000e+00> : vector<32x128xf32>
    %63 = tpu.matmul %61, %62, %cst_33 {dimension_numbers = #tpu.dot_dimension_numbers<[1], [0], [0], [1], [0, 0, 1, 1], [], []>} : vector<32x256xbf16>, vector<256x128xbf16>, vector<32x128xf32> -> vector<32x128xf32>
    %64 = vector.extract_strided_slice %0 {offsets = [2, 0], sizes = [1, 128], strides = [1, 1]} : vector<3x256xf32> to vector<1x128xf32>
    %65 = vector.broadcast %64 : vector<1x128xf32> to vector<32x128xf32>
    %66 = arith.addf %63, %65 : vector<32x128xf32>
    %cst_34 = arith.constant 0.000000e+00 : f32
    %67 = vector.broadcast %cst_34 : f32 to vector<32x128xf32>
    %68 = arith.maximumf %66, %67 : vector<32x128xf32>
    %c0_35 = arith.constant 0 : index
    %c0_36 = arith.constant 0 : index
    %69 = vector.load %arg7[%c0_35, %c0_36] : memref<32x128xf32, #tpu.memory_space<vmem>>, vector<32x128xf32>
    tpu.vector_store %arg7[%c0_35, %c0_36], %68 {strides = array<i32>} : memref<32x128xf32, #tpu.memory_space<vmem>>, vector<32x128xf32>,
    return
  }
  func.func @transform_0(%arg0: i32) -> (i32, i32) {
    %c0_i32 = arith.constant 0 : i32
    %c0_i32_0 = arith.constant 0 : i32
    return %arg0, %c0_i32 : i32, i32
  }
  func.func @transform_1(%arg0: i32) -> (i32, i32) {
    %c0_i32 = arith.constant 0 : i32
    %c0_i32_0 = arith.constant 0 : i32
    return %arg0, %c0_i32 : i32, i32
  }
  func.func @transform_2(%arg0: i32) -> (i32, i32, i32) {
    %c0_i32 = arith.constant 0 : i32
    %c0_i32_0 = arith.constant 0 : i32
    %c0_i32_1 = arith.constant 0 : i32
    %c0_i32_2 = arith.constant 0 : i32
    return %c0_i32, %c0_i32_0, %c0_i32_1 : i32, i32, i32
  }
  func.func @transform_3(%arg0: i32) -> (i32, i32, i32) {
    %c0_i32 = arith.constant 0 : i32
    %c0_i32_0 = arith.constant 0 : i32
    %c0_i32_1 = arith.constant 0 : i32
    %c0_i32_2 = arith.constant 0 : i32
    return %c0_i32, %c0_i32_0, %c0_i32_1 : i32, i32, i32
  }
  func.func @transform_4(%arg0: i32) -> (i32, i32) {
    %c0_i32 = arith.constant 0 : i32
    %c0_i32_0 = arith.constant 0 : i32
    %c0_i32_1 = arith.constant 0 : i32
    return %c0_i32, %c0_i32_0 : i32, i32
  }
  func.func @transform_5(%arg0: i32) -> (i32, i32) {
    %c0_i32 = arith.constant 0 : i32
    %c0_i32_0 = arith.constant 0 : i32
    %c0_i32_1 = arith.constant 0 : i32
    return %c0_i32, %c0_i32_0 : i32, i32
  }
  func.func @transform_6(%arg0: i32) -> (i32, i32) {
    %c0_i32 = arith.constant 0 : i32
    %c0_i32_0 = arith.constant 0 : i32
    return %arg0, %c0_i32 : i32, i32
  }
}

</mosaic_0001>

<bundles_post_ra>
// kernel: tpu_custom_call.1
= control target key start
LH: loop header
LB: loop body
LE: loop exit
PB: predicated region body
PF: predicated region fallthrough
CT: control target
= control target key end

     0   :  { %11 = vsyncpa [#allocation3], 0  ;;  %s2241_s0 = inlined_call_operand.hbm [shape: bf16[32,64], index: 0, kind: input, shape index: {}]   ;;  %s2242_s1 = inlined_call_operand.hbm [shape: bf16[32,64], index: 1, kind: input, shape index: {}]   ;;  %s2243_s2 = inlined_call_operand.hbm [shape: bf16[2,64,256], index: 2, kind: input, shape index: {}]   ;;  %s2244_s3 = inlined_call_operand.hbm [shape: bf16[3,256,256], index: 3, kind: input, shape index: {}]   ;;  %s2245_s4 = inlined_call_operand.hbm [shape: bf16[256,128], index: 4, kind: input, shape index: {}]   ;;  %s2246_s5 = inlined_call_operand.vmem [shape: f32[3,256], index: 5, kind: input, shape index: {}]   ;;  %s2247_s6 = inlined_call_operand.hbm [shape: f32[32,128], index: 6, kind: output, shape index: {}]  }
   0x1   :  { %12 = vsyncpa [#allocation6], 0 }
   0x2   :  { %13 = vsyncpa [#allocation9], 0 }
   0x3   :  { %14 = vsyncpa [#allocation4], 0  ;;  %s2015_s21 = smov [#allocation5]  }
   0x4   :  { %s32_s22 = sshll.u32 %s2015_s21, 4  ;;  %s33_s22 = int_to_ptr.vmem [resolvable:$true] %s32_s22 }
   0x5   :  { %s1895_s23 = scalar_lea.vmem %s33_s22, 256  ;;  %p1900_p1 = scmp.lt.s32.totalorder %s33_s22, %s33_s22 }
   0x6   :  { %p1896_p0 = scmp.ne.s32.totalorder %s33_s22, %s1895_s23  ;;  %p1901_p2 = scmp.lt.s32.totalorder %s1895_s23, %s1895_s23 }
   0x8   :  { %p1902_p3 = por %p1901_p2, %p1900_p1 }
   0xa   :  { %p1903_p4 = pnand %p1902_p3, %p1896_p0 }
   0xc   :  { %1906 = shalt.err (!%p1903_p4)
}
   0xd   :  { %s2016_s24 = smov 64   ;;  %s2017_s25 = smov 4  }
   0xe   :  { %38 = dma.hbm_to_vmem [thread:$0]  %s2242_s1, 256, %s33_s22, [#allocation6], %s2016_s24, %s2016_s24, %s2017_s25  }
   0xf   :  { %s2018_s28 = smov [#allocation8]   ;;  %s2019_s30 = smov [#allocation2]  }
  0x10   :  { %s56_s29 = sshll.u32 %s2018_s28, 4  ;;  %s20_s7 = sshll.u32 %s2019_s30, 4  ;;  %s57_s29 = int_to_ptr.vmem [resolvable:$true] %s56_s29  ;;  %s21_s7 = int_to_ptr.vmem [resolvable:$true] %s20_s7 }
  0x11   :  { %s1915_s8 = scalar_lea.vmem %s57_s29, 12288  ;;  %p1920_p6 = scmp.lt.s32.totalorder %s57_s29, %s57_s29 }
  0x12   :  { %p1916_p5 = scmp.ne.s32.totalorder %s57_s29, %s1915_s8  ;;  %p1921_p7 = scmp.lt.s32.totalorder %s1915_s8, %s1915_s8 }
  0x14   :  { %p1922_p8 = por %p1921_p7, %p1920_p6 }
  0x16   :  { %p1923_p9 = pnand %p1922_p8, %p1916_p5 }
  0x18   :  { %1926 = shalt.err (!%p1923_p9)
}
  0x19   :  { %s2020_s9 = smov 128   ;;  %s2021_s10 = smov 8  }
  0x1a   :  { %62 = dma.hbm_to_vmem [thread:$0]  %s2244_s3, 12288, %s57_s29, [#allocation9], %s2020_s9, %s2020_s9, %s2021_s10  }
  0x1b   :  { %s1935_s1 = scalar_lea.vmem %s21_s7, 256  ;;  %p1940_p11 = scmp.lt.s32.totalorder %s21_s7, %s21_s7 }
  0x1c   :  { %p1936_p10 = scmp.ne.s32.totalorder %s21_s7, %s1935_s1  ;;  %p1941_p12 = scmp.lt.s32.totalorder %s1935_s1, %s1935_s1 }
  0x1e   :  { %p1942_p13 = por %p1941_p12, %p1940_p11 }
  0x20   :  { %p1943_p0 = pnand %p1942_p13, %p1936_p10 }
  0x22   :  { %1946 = shalt.err (!%p1943_p0)
}
  0x23   :  { %26 = dma.hbm_to_vmem [thread:$0]  %s2241_s0, 256, %s21_s7, [#allocation3], %s2016_s24, %s2016_s24, %s2017_s25  }
  0x24   :  { %s2022_s15 = smov [#allocation7]   ;;  %s2023_s17 = smov [#allocation10]  }
  0x25   :  { %s44_s16 = sshll.u32 %s2022_s15, 4  ;;  %s68_s3 = sshll.u32 %s2023_s17, 4  ;;  %s45_s16 = int_to_ptr.vmem [resolvable:$true] %s44_s16  ;;  %s69_s3 = int_to_ptr.vmem [resolvable:$true] %s68_s3 }
  0x26   :  { %s1955_s18 = scalar_lea.vmem %s45_s16, 2048  ;;  %p1960_p2 = scmp.lt.s32.totalorder %s45_s16, %s45_s16 }
  0x27   :  { %p1956_p1 = scmp.ne.s32.totalorder %s45_s16, %s1955_s18  ;;  %p1961_p3 = scmp.lt.s32.totalorder %s1955_s18, %s1955_s18 }
  0x29   :  { %p1962_p4 = por %p1961_p3, %p1960_p2 }
  0x2b   :  { %p1963_p5 = pnand %p1962_p4, %p1956_p1 }
  0x2d   :  { %1966 = shalt.err (!%p1963_p5)
}
  0x2e   :  { %50 = dma.hbm_to_vmem [thread:$0]  %s2243_s2, 2048, %s45_s16, [#allocation6], %s2020_s9, %s2020_s9, %s2021_s10  }
  0x2f   :  { %s1975_s0 = scalar_lea.vmem %s69_s3, 2048  ;;  %p1980_p7 = scmp.lt.s32.totalorder %s69_s3, %s69_s3 }
  0x30   :  { %p1976_p6 = scmp.ne.s32.totalorder %s69_s3, %s1975_s0  ;;  %p1981_p8 = scmp.lt.s32.totalorder %s1975_s0, %s1975_s0 }
  0x32   :  { %p1982_p9 = por %p1981_p8, %p1980_p7 }
  0x34   :  { %p1983_p10 = pnand %p1982_p9, %p1976_p6 }
  0x36   :  { %1986 = shalt.err (!%p1983_p10)
}
  0x37   :  { %74 = dma.hbm_to_vmem [thread:$0]  %s2245_s4, 2048, %s69_s3, [#allocation9], %s2016_s24, %s2016_s24, %s2017_s25  }
  0x38   :  { %2007 = dma.done.wait [#allocation3], 256  }
  0x39   :  { %2008 = vsyncadd [#allocation3], 4294967040 }
  0x3a   :  { %2009 = dma.done.wait [#allocation6], 2304  }
  0x3b   :  { %2010 = vsyncadd [#allocation6], 4294964992 }
  0x3c   :  { %2011 = dma.done.wait [#allocation9], 14336  }
  0x3d   :  { %2012 = vsyncadd [#allocation9], 4294952960  ;;  %v2024_v0 = vmov 0   ;;  %v1699_v1 = vld [vmem:[#allocation7 + $0x74] ss:$8 sps:$4 sm:$0xff]   ;;  %vm169_vm0 = vcmask 523264  }
  0x3e   :  { %208 = vmatprep.mubr.bf16.mxu1 %v2024_v0  ;;  %v1701_v2 = vld [vmem:[#allocation7 + $0x70] ss:$8 sps:$4 sm:$0xff]   ;;  %184 = vmatprep.subr.bf16.mxu1 %v1699_v1  ;;  %v1702_v3 = vld [vmem:[#allocation7 + $0x64] ss:$8 sps:$4 sm:$0xff]   ;;  %v1704_v4 = vld [vmem:[#allocation7 + $0x60] ss:$8 sps:$4 sm:$0xff]  }
  0x3f   :  { %185 = vmatpush1.bf16.msra.mxu1 %v1701_v2  ;;  %v1705_v5 = vld [vmem:[#allocation7 + $0x54] ss:$8 sps:$4 sm:$0xff]   ;;  %v1707_v6 = vld [vmem:[#allocation7 + $0x50] ss:$8 sps:$4 sm:$0xff]   ;;  %v1708_v7 = vld [vmem:[#allocation7 + $0x44] ss:$8 sps:$4 sm:$0xff]  }
  0x40   :  { %186 = vmatprep.subr.bf16.mxu1 %v1702_v3  ;;  %v1710_v8 = vld [vmem:[#allocation7 + $0x40] ss:$8 sps:$4 sm:$0xff]   ;;  %v1711_v9 = vld [vmem:[#allocation5] sm:$0xff]   ;;  %v1717_v12 = vld [vmem:[#allocation7 + $0x24] ss:$8 sps:$4 sm:$0xff]   ;;  %vm2025_vm5 = vmmov 1  }
  0x41   :  { %v1714_v10 = vld [vmem:[#allocation7 + $0x34] ss:$8 sps:$4 sm:$0xff]   ;;  %v1712_v11 = vld [vmem:[#allocation7 + $0x30] ss:$8 sps:$4 sm:$0xff]   ;;  %v1730_v15 = vld [vmem:[#allocation8 + $0x164] ss:$8 sps:$4 sm:$0xff]  }
  0x42   :  { %v1727_v13 = vld [vmem:[#allocation8 + $0x174] ss:$8 sps:$4 sm:$0xff]   ;;  %v1729_v14 = vld [vmem:[#allocation8 + $0x170] ss:$8 sps:$4 sm:$0xff]   ;;  %v1715_v16 = vld [vmem:[#allocation7 + $0x20] ss:$8 sps:$4 sm:$0xff]  }
  0x43   :  { %187 = vmatpush1.bf16.msra.mxu1 %v1704_v4  ;;  %721 = vmatprep.subr.bf16.mxu0 %v1727_v13  ;;  %v1732_v17 = vld [vmem:[#allocation8 + $0x160] ss:$8 sps:$4 sm:$0xff]   ;;  %v1733_v18 = vld [vmem:[#allocation8 + $0x154] ss:$8 sps:$4 sm:$0xff]   ;;  %v1735_v21 = vld [vmem:[#allocation8 + $0x150] ss:$8 sps:$4 sm:$0xff]  }
  0x44   :  { %188 = vmatprep.subr.bf16.mxu1 %v1705_v5  ;;  %722 = vmatpush1.bf16.msra.mxu0 %v1729_v14  ;;  %v1721_v19 = vld [vmem:[#allocation7 + $0x14] ss:$8 sps:$4 sm:$0xff]   ;;  %v1719_v22 = vld [vmem:[#allocation7 + $0x10] ss:$8 sps:$4 sm:$0xff]   ;;  %v1724_v23 = vld [vmem:[#allocation7 + $0x4] ss:$8 sps:$4 sm:$0xff]  }
  0x45   :  { %723 = vmatprep.subr.bf16.mxu0 %v1730_v15  ;;  %v1718_v20 = vld [vmem:[#allocation5 + $0x8] sm:$0xff]   ;;  %v1736_v24 = vld [vmem:[#allocation8 + $0x144] ss:$8 sps:$4 sm:$0xff]   ;;  %v1722_v25 = vld [vmem:[#allocation7] ss:$8 sps:$4 sm:$0xff]  }
  0x46   :  { %v1741_v26 = vld [vmem:[#allocation8 + $0x140] ss:$8 sps:$4 sm:$0xff]   ;;  %v1742_v27 = vld [vmem:[#allocation8 + $0x134] ss:$8 sps:$4 sm:$0xff]   ;;  %v1747_v30 = vld [vmem:[#allocation8 + $0x130] ss:$8 sps:$4 sm:$0xff]  }
  0x47   :  { %189 = vmatpush1.bf16.msra.mxu1 %v1707_v6  ;;  %v1740_v28 = vld [vmem:[#allocation8 + $0x74] ss:$8 sps:$4 sm:$0xff]   ;;  %v1725_v29 = vld [vmem:[#allocation2] sm:$0xff]   ;;  %v1738_v31 = vld [vmem:[#allocation8 + $0x70] ss:$8 sps:$4 sm:$0xff]  }
  0x48   :  { %190 = vmatprep.subr.bf16.mxu1 %v1708_v7  ;;  %724 = vmatpush1.bf16.msra.mxu0 %v1732_v17  ;;  %v1746_v32 = vld [vmem:[#allocation8 + $0x64] ss:$8 sps:$4 sm:$0xff]   ;;  %v1744_v34 = vld [vmem:[#allocation8 + $0x60] ss:$8 sps:$4 sm:$0xff]   ;;  %v1752_v36 = vld [vmem:[#allocation8 + $0x54] ss:$8 sps:$4 sm:$0xff]  }
  0x49   :  { %725 = vmatprep.subr.bf16.mxu0 %v1733_v18  ;;  %v1748_v33 = vld [vmem:[#allocation8 + $0x124] ss:$8 sps:$4 sm:$0xff]   ;;  %v1753_v35 = vld [vmem:[#allocation8 + $0x120] ss:$8 sps:$4 sm:$0xff]   ;;  %v1754_v37 = vld [vmem:[#allocation8 + $0x114] ss:$8 sps:$4 sm:$0xff]  }
  0x4a   :  { %v1726_v38 = vld [vmem:[#allocation2 + $0x8] sm:$0xff]   ;;  %v1759_v39 = vld [vmem:[#allocation8 + $0x110] ss:$8 sps:$4 sm:$0xff]   ;;  %v1766_v45 = vld [vmem:[#allocation8 + $0x1f4] ss:$8 sps:$4 sm:$0xff]  }
  0x4b   :  { %191 = vmatpush1.bf16.msra.mxu1 %v1710_v8  ;;  %v1750_v40 = vld [vmem:[#allocation8 + $0x50] ss:$8 sps:$4 sm:$0xff]   ;;  %v1760_v41 = vld [vmem:[#allocation8 + $0x104] ss:$8 sps:$4 sm:$0xff]   ;;  %v1765_v43 = vld [vmem:[#allocation8 + $0x100] ss:$8 sps:$4 sm:$0xff]  }
  0x4c   :  { %293 = vmatprep.subr.bf16.mxu1 %v1714_v10  ;;  %726 = vmatpush1.bf16.msra.mxu0 %v1735_v21  ;;  %v1758_v42 = vld [vmem:[#allocation8 + $0x44] ss:$8 sps:$4 sm:$0xff]   ;;  %v1756_v44 = vld [vmem:[#allocation8 + $0x40] ss:$8 sps:$4 sm:$0xff]   ;;  %v1764_v46 = vld [vmem:[#allocation8 + $0x34] ss:$8 sps:$4 sm:$0xff]  }
  0x4d   :  { %727 = vmatprep.subr.bf16.mxu0 %v1736_v24  ;;  %v1762_v47 = vld [vmem:[#allocation8 + $0x30] ss:$8 sps:$4 sm:$0xff]   ;;  %v1770_v48 = vld [vmem:[#allocation8 + $0x24] ss:$8 sps:$4 sm:$0xff]   ;;  %v1768_v49 = vld [vmem:[#allocation8 + $0x20] ss:$8 sps:$4 sm:$0xff]  }
  0x4e   :  { %1497 = vmatmul.mubr.msk.bf16.vlgmr.msra.gmra.mxu1 %vm169_vm0, %v1711_v9  ;;  %v1771_v50 = vld [vmem:[#allocation8 + $0x1f0] ss:$8 sps:$4 sm:$0xff]   ;;  %v1772_v51 = vld [vmem:[#allocation8 + $0x1e4] ss:$8 sps:$4 sm:$0xff]   ;;  %v1776_v52 = vld [vmem:[#allocation8 + $0x14] ss:$8 sps:$4 sm:$0xff]  }
  0x4f   :  { %294 = vmatpush1.bf16.msra.mxu1 %v1712_v11  ;;  %218 = vmatprep.mubr.bf16.mxu1 %v2024_v0  ;;  %v1774_v53 = vld [vmem:[#allocation8 + $0x10] ss:$8 sps:$4 sm:$0xff]   ;;  %v1777_v54 = vld [vmem:[#allocation8 + $0x1e0] ss:$8 sps:$4 sm:$0xff]   ;;  %v1778_v55 = vld [vmem:[#allocation8 + $0x1d4] ss:$8 sps:$4 sm:$0xff]  }
  0x50   :  { %295 = vmatprep.subr.bf16.mxu1 %v1717_v12  ;;  %728 = vmatpush1.bf16.msra.mxu0 %v1741_v26  ;;  %v1782_v56 = vld [vmem:[#allocation8 + $0x4] ss:$8 sps:$4 sm:$0xff]   ;;  %v1780_v57 = vld [vmem:[#allocation8] ss:$8 sps:$4 sm:$0xff]   ;;  %v1783_v58 = vld [vmem:[#allocation8 + $0x1d0] ss:$8 sps:$4 sm:$0xff]  }
  0x51   :  { %729 = vmatprep.subr.bf16.mxu0 %v1742_v27  ;;  %v1784_v59 = vld [vmem:[#allocation8 + $0x1c4] ss:$8 sps:$4 sm:$0xff]   ;;  %v1788_v60 = vld [vmem:[#allocation8 + $0xf4] ss:$8 sps:$4 sm:$0xff]   ;;  %v1786_v61 = vld [vmem:[#allocation8 + $0xf0] ss:$8 sps:$4 sm:$0xff]  }
  0x52   :  { %v1789_v62 = vld [vmem:[#allocation8 + $0x1c0] ss:$8 sps:$4 sm:$0xff]   ;;  %v1790_v63 = vld [vmem:[#allocation8 + $0x1b4] ss:$8 sps:$4 sm:$0xff]   ;;  %v1795_v2 = vld [vmem:[#allocation8 + $0x1b0] ss:$8 sps:$4 sm:$0xff]  }
  0x53   :  { %296 = vmatpush1.bf16.msra.mxu1 %v1715_v16  ;;  %v1792_v1 = vld [vmem:[#allocation8 + $0xe0] ss:$8 sps:$4 sm:$0xff]   ;;  %v1796_v3 = vld [vmem:[#allocation8 + $0x1a4] ss:$8 sps:$4 sm:$0xff]   ;;  %v1800_v4 = vld [vmem:[#allocation8 + $0xd4] ss:$8 sps:$4 sm:$0xff]  }
  0x54   :  { %297 = vmatprep.subr.bf16.mxu1 %v1721_v19  ;;  %730 = vmatpush1.bf16.msra.mxu0 %v1747_v30  ;;  %v1798_v5 = vld [vmem:[#allocation8 + $0xd0] ss:$8 sps:$4 sm:$0xff]   ;;  %v1801_v6 = vld [vmem:[#allocation8 + $0x1a0] ss:$8 sps:$4 sm:$0xff]   ;;  %v1802_v7 = vld [vmem:[#allocation8 + $0x194] ss:$8 sps:$4 sm:$0xff]  }
  0x55   :  { %731 = vmatprep.subr.bf16.mxu0 %v1748_v33  ;;  %v1806_v8 = vld [vmem:[#allocation8 + $0xc4] ss:$8 sps:$4 sm:$0xff]   ;;  %v1804_v9 = vld [vmem:[#allocation8 + $0xc0] ss:$8 sps:$4 sm:$0xff]   ;;  %v1807_v10 = vld [vmem:[#allocation8 + $0x190] ss:$8 sps:$4 sm:$0xff]  }
  0x56   :  { %1498 = vmatmul.mubr.msk.bf16.gmra.mxu1 %vm169_vm0, %v1718_v20  ;;  %v1808_v11 = vld [vmem:[#allocation8 + $0x184] ss:$8 sps:$4 sm:$0xff]   ;;  %v1812_v12 = vld [vmem:[#allocation8 + $0xb4] ss:$8 sps:$4 sm:$0xff]   ;;  %v1810_v13 = vld [vmem:[#allocation8 + $0xb0] ss:$8 sps:$4 sm:$0xff]  }
  0x57   :  { %298 = vmatpush1.bf16.msra.mxu1 %v1719_v22  ;;  %317 = vmatprep.mubr.bf16.mxu1 %v2024_v0  ;;  %v1813_v14 = vld [vmem:[#allocation8 + $0x180] ss:$8 sps:$4 sm:$0xff]   ;;  %v1816_v15 = vld [vmem:[#allocation8 + $0xa4] ss:$8 sps:$4 sm:$0xff]   ;;  %v1819_v16 = vld [vmem:[#allocation8 + $0x274] ss:$8 sps:$4 sm:$0xff]  }
  0x58   :  { %299 = vmatprep.subr.bf16.mxu1 %v1724_v23  ;;  %732 = vmatpush1.bf16.msra.mxu0 %v1753_v35  ;;  %v1814_v17 = vld [vmem:[#allocation8 + $0xa0] ss:$8 sps:$4 sm:$0xff]   ;;  %v1822_v18 = vld [vmem:[#allocation8 + $0x94] ss:$8 sps:$4 sm:$0xff]   ;;  %v1820_v19 = vld [vmem:[#allocation8 + $0x90] ss:$8 sps:$4 sm:$0xff]  }
  0x59   :  { %733 = vmatprep.subr.bf16.mxu0 %v1754_v37  ;;  %v1826_v20 = vld [vmem:[#allocation8 + $0x80] ss:$8 sps:$4 sm:$0xff]   ;;  %v1828_v21 = vld [vmem:[#allocation8 + $0x84] ss:$8 sps:$4 sm:$0xff]  }
  0x5b   :  { %300 = vmatpush1.bf16.msra.mxu1 %v1722_v25  ;;  %v339_v25 = vlaneseq }
  0x5c   :  { %934 = vmatprep.subr.bf16.mxu1 %v1740_v28  ;;  %734 = vmatpush1.bf16.msra.mxu0 %v1759_v39 }
  0x5d   :  { %735 = vmatprep.subr.bf16.mxu0 %v1760_v41  ;;  %v2100_v28 = vshrl.u32 %v339_v25, 7 }
  0x5e   :  { %1509 = vmatmul.mubr.msk.bf16.vlgmr.msra.gmra.mxu1 %vm169_vm0, %v1725_v29 }
  0x5f   :  { %327 = vmatprep.mubr.bf16.mxu1 %v2024_v0  ;;  %935 = vmatpush1.bf16.msra.mxu1 %v1738_v31  ;;  %v1794_v0 = vld [vmem:[#allocation8 + $0xe4] ss:$8 sps:$4 sm:$0xff]   ;;  %v345_v31 = vsub.s32 4, %v2100_v28  ;;  %vm442_vm1 = vcmp.lt.s32.totalorder %v2100_v28, 1  ;;  %vm475_vm2 = vcmp.lt.s32.totalorder %v2100_v28, 7 }
  0x60   :  { %936 = vmatprep.subr.bf16.mxu1 %v1746_v32  ;;  %736 = vmatpush1.bf16.msra.mxu0 %v1765_v43  ;;  %v341_v32 = vsub.s32 0, %v2100_v28 }
  0x61   :  { %737 = vmatprep.subr.bf16.mxu0 %v1766_v45 }
  0x63   :  { %937 = vmatpush1.bf16.msra.mxu1 %v1744_v34  ;;  %v2107_v34 = vld [vmem:[%s2246_s5] sm:$0x77]  ;;  %s2026_s5 = smov [#allocation11]  }
  0x64   :  { %938 = vmatprep.subr.bf16.mxu1 %v1752_v36  ;;  %738 = vmatpush2.bf16.msra.mxu0 %v1771_v50  ;;  %v346_v36 = vrot.slane %v2107_v34, %v345_v31  ;;  %v342_v37 = vrot.slane %v2107_v34, %v341_v32  ;;  %s1473_s23 = sshll.u32 %s2026_s5, 4  ;;  %s1474_s23 = int_to_ptr.vmem [resolvable:$true] %s1473_s23 }
  0x65   :  { %739 = vmatprep.subr.bf16.mxu0 %v1772_v51  ;;  %s1987_s24 = scalar_lea.vmem %s1474_s23, 512  ;;  %p1992_p12 = scmp.lt.s32.totalorder %s1474_s23, %s1474_s23 }
  0x66   :  { %1510 = vmatmul.mubr.msk.bf16.gmra.mxu1 %vm169_vm0, %v1726_v38  ;;  %v352_v43 = vrot.slane %v342_v37, %v341_v32  ;;  %p1988_p11 = scmp.ne.s32.totalorder %s1474_s23, %s1987_s24  ;;  %p1993_p13 = scmp.lt.s32.totalorder %s1987_s24, %s1987_s24 }
  0x67   :  { %939 = vmatpush1.bf16.msra.mxu1 %v1750_v40  ;;  %v356_v40 = vrot.slane %v346_v36, %v341_v32 }
  0x68   :  { %940 = vmatprep.subr.bf16.mxu1 %v1758_v42  ;;  %740 = vmatpush2.bf16.msra.mxu0 %v1777_v54  ;;  %p1994_p0 = por %p1993_p13, %p1992_p12 }
  0x69   :  { %741 = vmatprep.subr.bf16.mxu0 %v1778_v55 }
  0x6a   :  { %p1995_p1 = pnand %p1994_p0, %p1988_p11 }
  0x6b   :  { %941 = vmatpush1.bf16.msra.mxu1 %v1756_v44 }
  0x6c   :  { %942 = vmatprep.subr.bf16.mxu1 %v1764_v46  ;;  %742 = vmatpush2.bf16.msra.mxu0 %v1783_v58 }
  0x6d   :  { %743 = vmatprep.subr.bf16.mxu0 %v1784_v59 }
  0x6f   :  { %943 = vmatpush1.bf16.msra.mxu1 %v1762_v47 }
  0x70   :  { %944 = vmatprep.subr.bf16.mxu1 %v1770_v48  ;;  %744 = vmatpush2.bf16.msra.mxu0 %v1789_v62 }
  0x71   :  { %745 = vmatprep.subr.bf16.mxu0 %v1790_v63 }
  0x73   :  { %945 = vmatpush1.bf16.msra.mxu1 %v1768_v49 }
  0x74   :  { %946 = vmatprep.subr.bf16.mxu1 %v1776_v52  ;;  %746 = vmatpush2.bf16.msra.mxu0 %v1795_v2 }
  0x75   :  { %747 = vmatprep.subr.bf16.mxu0 %v1796_v3  ;;  %v386_v3 = vand.u32 15, %v2100_v28 }
  0x77   :  { %947 = vmatpush1.bf16.msra.mxu1 %v1774_v53  ;;  %v379_v53 = vadd.s32 8, %v2100_v28  ;;  %vm2142_vm4 = vcmp.ne.s32.totalorder %v386_v3, 0  ;;  %v1847_v3 = vld [vmem:[#allocation8 + $0x2f0] ss:$8 sps:$4 sm:$0xff]  }
  0x78   :  { %948 = vmatprep.subr.bf16.mxu1 %v1782_v56  ;;  %748 = vmatpush2.bf16.msra.mxu0 %v1801_v6  ;;  %vm1576_vm8 = vmpackc.low %vm2025_vm5, %vm2142_vm4 }
  0x79   :  { %749 = vmatprep.subr.bf16.mxu0 %v1802_v7  ;;  %v393_v2 = vand.u32 15, %v379_v53  ;;  %v1825_v7 = vld [vmem:[#allocation8 + $0x264] ss:$8 sps:$4 sm:$0xff]   ;;  %v1835_v53 = vld [vmem:[#allocation8 + $0x230] ss:$8 sps:$4 sm:$0xff]  }
  0x7b   :  { %949 = vmatpush1.bf16.msra.mxu1 %v1780_v57  ;;  %vm2135_vm3 = vcmp.ne.s32.totalorder %v393_v2, 15  ;;  %v1849_v2 = vld [vmem:[#allocation8 + $0x2f4] ss:$8 sps:$4 sm:$0xff]  }
  0x7c   :  { %950 = vmatprep.subr.bf16.mxu1 %v1788_v60  ;;  %750 = vmatpush2.bf16.msra.mxu0 %v1807_v10  ;;  %vm2173_vm6 = vmpackc.low %vm2135_vm3, %vm2025_vm5 }
  0x7d   :  { %751 = vmatprep.subr.bf16.mxu0 %v1808_v11 }
  0x7f   :  { %951 = vmatpush2.bf16.msra.mxu1 %v1786_v61 }
  0x80   :  { %952 = vmatprep.subr.bf16.mxu1 %v1794_v0  ;;  %752 = vmatpush2.bf16.msra.mxu0 %v1813_v14 }
  0x81   :  { %1180 = vmatprep.subr.bf16.mxu0 %v1819_v16  ;;  %v1823_v16 = vld [vmem:[#allocation8 + $0x260] ss:$8 sps:$4 sm:$0xff]  }
  0x83   :  { %953 = vmatpush2.bf16.msra.mxu1 %v1792_v1  ;;  %v1817_v1 = vld [vmem:[#allocation8 + $0x270] ss:$8 sps:$4 sm:$0xff]  }
  0x84   :  { %954 = vmatprep.subr.bf16.mxu1 %v1800_v4 }
  0x87   :  { %955 = vmatpush2.bf16.msra.mxu1 %v1798_v5 }
  0x88   :  { %956 = vmatprep.subr.bf16.mxu1 %v1806_v8  ;;  %v380_v8 = vadd.s32 16, %v2100_v28 }
  0x8b   :  { %957 = vmatpush2.bf16.msra.mxu1 %v1804_v9 }
  0x8c   :  { %958 = vmatprep.subr.bf16.mxu1 %v1812_v12 }
  0x8f   :  { %959 = vmatpush2.bf16.msra.mxu1 %v1810_v13 }
  0x90   :  { %960 = vmatprep.subr.bf16.mxu1 %v1816_v15 }
  0x93   :  { %961 = vmatpush2.bf16.msra.mxu1 %v1814_v17  ;;  %v1867_v17 = vld [vmem:[#allocation8 + $0x294] ss:$8 sps:$4 sm:$0xff]  }
  0x94   :  { %962 = vmatprep.subr.bf16.mxu1 %v1822_v18 }
  0x97   :  { %963 = vmatpush2.bf16.msra.mxu1 %v1820_v19 }
  0x98   :  { %964 = vmatprep.subr.bf16.mxu1 %v1828_v21  ;;  %v1870_v21 = vld [vmem:[#allocation8 + $0x284] ss:$8 sps:$4 sm:$0xff]  }
  0x9b   :  { %965 = vmatpush2.bf16.msra.mxu1 %v1826_v20  ;;  %v1831_v20 = vld [vmem:[#allocation8 + $0x254] ss:$8 sps:$4 sm:$0xff]  }
 0x10e   :  { %v210_v22 = vpop.f32.mrf.mxu1 }
 0x110   :  { %v212_v23 = vpop.f32.mrf.mxu1 }
 0x112   :  { %v214_v24 = vpop.f32.mrf.mxu1 }
 0x114   :  { %v216_v26 = vpop.f32.mrf.mxu1 }
 0x116   :  { %v220_v27 = vpop.f32.mrf.mxu1 }
 0x118   :  { %v222_v29 = vpop.f32.mrf.mxu1 }
 0x11a   :  { %v224_v30 = vpop.f32.mrf.mxu1 }
 0x11c   :  { %v226_v33 = vpop.f32.mrf.mxu1 }
 0x11e   :  { %v319_v35 = vpop.f32.mrf.mxu1 }
 0x11f   :  { %v320_v42 = vadd.f32 %v319_v35, %v210_v22  ;;  %v400_v22 = vand.u32 15, %v380_v8  ;;  %v1853_v8 = vld [vmem:[#allocation8 + $0x2d0] ss:$8 sps:$4 sm:$0xff]  }
 0x120   :  { %v321_v38 = vpop.f32.mrf.mxu1 }
 0x121   :  { %v322_v39 = vadd.f32 %v321_v38, %v212_v23  ;;  %v357_v50 = vadd.f32 %v352_v43, %v320_v42  ;;  %vm1656_vm7 = vcmp.ne.s32.totalorder %v400_v22, 0 }
 0x122   :  { %v323_v41 = vpop.f32.mrf.mxu1  ;;  %vm2191_vm9 = vmpackc.low %vm2025_vm5, %vm1656_vm7 }
 0x123   :  { %v324_v44 = vadd.f32 %v323_v41, %v214_v24  ;;  %v358_v47 = vadd.f32 %v356_v40, %v322_v39  ;;  %v2118_v59 = vmax.f32 %v357_v50, 0.0  ;;  %v1834_v41 = vld [vmem:[#allocation8 + $0x244] ss:$8 sps:$4 sm:$0xff]  }
 0x124   :  { %v325_v45 = vpop.f32.mrf.mxu1  ;;  %v1877_v39 = vld [vmem:[#allocation10 + $0x60] sm:$0xff]  }
 0x125   :  { %v359_v46 = vadd.f32 %v352_v43, %v324_v44  ;;  %v326_v48 = vadd.f32 %v325_v45, %v216_v26  ;;  %v2114_v56 = vmax.f32 %v358_v47, 0.0  ;;  %v434_v18 = vrot.slane %v2118_v59, 7  ;;  %v1832_v47 = vld [vmem:[#allocation8 + $0x240] ss:$8 sps:$4 sm:$0xff]  }
 0x126   :  { %v329_v49 = vpop.f32.mrf.mxu1 }
 0x127   :  { %v360_v51 = vadd.f32 %v356_v40, %v326_v48  ;;  %v2112_v54 = vmax.f32 %v359_v46, 0.0  ;;  %v330_v60 = vadd.f32 %v329_v49, %v220_v27  ;;  %v435_v23 = vrot.slane %v2114_v56, 7 }
 0x128   :  { %v331_v52 = vpop.f32.mrf.mxu1  ;;  %v468_v24 = vrot.slane %v2114_v56, 1 }
 0x129   :  { %v332_v55 = vadd.f32 %v331_v52, %v222_v29  ;;  %v2116_v57 = vmax.f32 %v360_v51, 0.0  ;;  %v373_v6 = vpack.c.bf16 %v2112_v54, %v2118_v59  ;;  %v361_v10 = vadd.f32 %v352_v43, %v330_v60  ;;  %v1837_v51 = vld [vmem:[#allocation8 + $0x234] ss:$8 sps:$4 sm:$0xff]  }
 0x12a   :  { %v333_v58 = vpop.f32.mrf.mxu1  ;;  %v436_v25 = vrot.slane %v2112_v54, 7 }
 0x12b   :  { %v362_v61 = vadd.f32 %v356_v40, %v332_v55  ;;  %v334_v62 = vadd.f32 %v333_v58, %v224_v30  ;;  %v374_v0 = vpack.c.bf16 %v2116_v57, %v2114_v56  ;;  %v437_v13 = vrot.slane %v2116_v57, 7 }
 0x12c   :  { %v335_v63 = vpop.f32.mrf.mxu1  ;;  %v470_v14 = vrot.slane %v2116_v57, 1  ;;  %v2150_v27 = vmax.f32 %v361_v10, 0.0  ;;  %v447_v45 = vsel %vm442_vm1, %v434_v18, %v436_v25  ;;  %v1840_v57 = vld [vmem:[#allocation8 + $0x224] ss:$8 sps:$4 sm:$0xff]   ;;  %v1856_v10 = vld [vmem:[#allocation8 + $0x2c0] ss:$8 sps:$4 sm:$0xff]  }
 0x12d   :  { %v2123_v4 = vmax.f32 %v362_v61, 0.0  ;;  %v336_v5 = vadd.f32 %v335_v63, %v226_v33  ;;  %v363_v9 = vadd.f32 %v352_v43, %v334_v62  ;;  %753 = vmatprep.mubr.bf16.mxu0 %v374_v0  ;;  %v1829_v33 = vld [vmem:[#allocation8 + $0x250] ss:$8 sps:$4 sm:$0xff]   ;;  %v448_v36 = vsel %vm442_vm1, %v435_v23, %v437_v13  ;;  %v1838_v61 = vld [vmem:[#allocation8 + $0x220] ss:$8 sps:$4 sm:$0xff]  }
 0x12e   :  { %754 = vmatmul.mubr.bf16.vlgmr.msra.gmra.mxu0 %v373_v6  ;;  %v481_v35 = vsel %vm475_vm2, %v468_v24, %v470_v14  ;;  %v438_v52 = vrot.slane %v2150_v27, 7  ;;  %v1843_v62 = vld [vmem:[#allocation8 + $0x214] ss:$8 sps:$4 sm:$0xff]   ;;  %v1841_v63 = vld [vmem:[#allocation8 + $0x210] ss:$8 sps:$4 sm:$0xff]   ;;  %v471_v22 = vrot.slane %v2150_v27, 1 }
 0x12f   :  { %v472_v11 = vrot.slane %v2123_v4, 1  ;;  %v364_v12 = vadd.f32 %v356_v40, %v336_v5  ;;  %v2133_v15 = vmax.f32 %v363_v9, 0.0  ;;  %1181 = vmatpush1.bf16.msra.mxu0 %v1817_v1  ;;  %v439_v32 = vrot.slane %v2123_v4, 7  ;;  %v1846_v0 = vld [vmem:[#allocation8 + $0x204] ss:$8 sps:$4 sm:$0xff]  }
 0x130   :  { %1182 = vmatprep.subr.bf16.mxu0 %v1825_v7  ;;  %v445_v58 = vsel %vm442_vm1, %v436_v25, %v438_v52  ;;  %v1844_v1 = vld [vmem:[#allocation8 + $0x200] ss:$8 sps:$4 sm:$0xff]   ;;  %v1852_v5 = vld [vmem:[#allocation8 + $0x2e4] ss:$8 sps:$4 sm:$0xff]   ;;  %v1855_v7 = vld [vmem:[#allocation8 + $0x2d4] ss:$8 sps:$4 sm:$0xff]  }
 0x131   :  { %v2140_v19 = vmax.f32 %v364_v12, 0.0  ;;  %v440_v26 = vrot.slane %v2133_v15, 7  ;;  %v479_v31 = vsel %vm475_vm2, %v470_v14, %v472_v11  ;;  %v375_v38 = vpack.c.bf16 %v2133_v15, %v2150_v27  ;;  %v1850_v6 = vld [vmem:[#allocation8 + $0x2e0] ss:$8 sps:$4 sm:$0xff]   ;;  %v1858_v9 = vld [vmem:[#allocation8 + $0x2c4] ss:$8 sps:$4 sm:$0xff]  }
 0x132   :  { %v1625_v42 = vpack.c.bf16 %v479_v31, %v481_v35  ;;  %v446_v48 = vsel %vm442_vm1, %v437_v13, %v439_v32  ;;  %v1861_v12 = vld [vmem:[#allocation8 + $0x2b4] ss:$8 sps:$4 sm:$0xff]   ;;  %v1859_v13 = vld [vmem:[#allocation8 + $0x2b0] ss:$8 sps:$4 sm:$0xff]   ;;  %v1864_v14 = vld [vmem:[#allocation8 + $0x2a4] ss:$8 sps:$4 sm:$0xff]  }
 0x133   :  { %v441_v29 = vrot.slane %v2140_v19, 7  ;;  %v376_v30 = vpack.c.bf16 %v2140_v19, %v2123_v4  ;;  %1183 = vmatpush1.bf16.msra.mxu0 %v1823_v16  ;;  %v449_v37 = vsel %vm442_vm1, %v440_v26, %v434_v18  ;;  %v443_v55 = vsel %vm442_vm1, %v438_v52, %v440_v26  ;;  %v1862_v16 = vld [vmem:[#allocation8 + $0x2a0] ss:$8 sps:$4 sm:$0xff]   ;;  %v1872_v35 = vld [vmem:[#allocation10 + $0x38] sm:$0xff]  }
 0x134   :  { %1184 = vmatprep.subr.bf16.mxu0 %v1831_v20  ;;  %v1581_v46 = vpack.c.bf16 %v447_v45, %v449_v37  ;;  %v1589_v60 = vpack.c.bf16 %v443_v55, %v445_v58  ;;  %v381_v18 = vadd.s32 24, %v2100_v28  ;;  %v1865_v20 = vld [vmem:[#allocation8 + $0x290] ss:$8 sps:$4 sm:$0xff]   ;;  %v474_v25 = vrot.slane %v2140_v19, 1  ;;  %v1883_v45 = vld [vmem:[#allocation10 + $0x48] sm:$0xff]  }
 0x135   :  { %763 = vmatprep.mubr.bf16.mxu0 %v376_v30  ;;  %v450_v40 = vsel %vm442_vm1, %v441_v29, %v435_v23  ;;  %v444_v44 = vsel %vm442_vm1, %v439_v32, %v441_v29  ;;  %v469_v26 = vrot.slane %v2112_v54, 1  ;;  %v1868_v29 = vld [vmem:[#allocation8 + $0x280] ss:$8 sps:$4 sm:$0xff]   ;;  %v467_v30 = vrot.slane %v2118_v59, 1  ;;  %v1874_v37 = vld [vmem:[#allocation10 + $0x30] sm:$0xff]  }
 0x136   :  { %v1577_v43 = vpack.c.bf16 %v448_v36, %v450_v40  ;;  %764 = vmatmul.mubr.bf16.gmra.mxu0 %v375_v38  ;;  %v1585_v50 = vpack.c.bf16 %v444_v44, %v446_v48  ;;  %v407_v23 = vand.u32 15, %v381_v18  ;;  %v477_v32 = vsel %vm475_vm2, %v472_v11, %v474_v25  ;;  %v1873_v36 = vld [vmem:[#allocation10 + $0x70] sm:$0xff]   ;;  %v1876_v38 = vld [vmem:[#allocation10 + $0x28] sm:$0xff]   ;;  %v1878_v40 = vld [vmem:[#allocation10 + $0x20] sm:$0xff]  }
 0x137   :  { %1185 = vmatpush1.bf16.msra.mxu0 %v1829_v33  ;;  %1626 = vmatprep.mubr.msk.bf16.mxu0 %vm2173_vm6, %v1625_v42  ;;  %v478_v31 = vsel %vm475_vm2, %v469_v26, %v471_v22  ;;  %v483_v19 = vsel %vm475_vm2, %v474_v25, %v468_v24  ;;  %v480_v54 = vsel %vm475_vm2, %v467_v30, %v469_v26  ;;  %v473_v59 = vrot.slane %v2133_v15, 1  ;;  %v1871_v24 = vld [vmem:[#allocation10 + $0x78] sm:$0xff]   ;;  %v1875_v15 = vld [vmem:[#allocation10 + $0x68] sm:$0xff]   ;;  %v1882_v44 = vld [vmem:[#allocation10 + $0x10] sm:$0xff]  }
 0x138   :  { %1578 = vmatprep.mubr.msk.bf16.mxu1 %vm1576_vm8, %v1577_v43  ;;  %1186 = vmatprep.subr.bf16.mxu0 %v1834_v41  ;;  %vm1658_vm10 = vcmp.ne.s32.totalorder %v407_v23, 15  ;;  %v1629_v27 = vpack.c.bf16 %v478_v31, %v480_v54  ;;  %v1633_v33 = vpack.c.bf16 %v483_v19, %v477_v32  ;;  %v1879_v41 = vld [vmem:[#allocation10 + $0x58] sm:$0xff]   ;;  %v1881_v43 = vld [vmem:[#allocation10 + $0x50] sm:$0xff]   ;;  %v1886_v48 = vld [vmem:[#allocation10] sm:$0xff]  }
 0x139   :  { %1582 = vmatmul.mubr.msk.bf16.vlgmr.msra.gmra.mxu1 %vm1576_vm8, %v1581_v46  ;;  %vm1632_vm11 = vmpackc.low %vm1658_vm10, %vm2025_vm5  ;;  %v476_v56 = vsel %vm475_vm2, %v471_v22, %v473_v59  ;;  %v482_v4 = vsel %vm475_vm2, %v473_v59, %v467_v30  ;;  %1659 = vmatprep.subr.bf16.mxu1 %v1871_v24  ;;  %v1880_v42 = vld [vmem:[#allocation10 + $0x18] sm:$0xff]   ;;  %v1884_v46 = vld [vmem:[#allocation10 + $0x8] sm:$0xff]  }
 0x13a   :  { %1586 = vmatprep.mubr.msk.bf16.mxu1 %vm2191_vm9, %v1585_v50  ;;  %v1637_v11 = vpack.c.bf16 %v482_v4, %v476_v56  ;;  %1660 = vmatpush3.bf16.msra.mxu1 %v1872_v35 }
 0x13b   :  { %1187 = vmatpush1.bf16.msra.mxu0 %v1832_v47  ;;  %1661 = vmatprep.subr.bf16.mxu1 %v1873_v36  ;;  %v1885_v47 = vld [vmem:[#allocation10 + $0x40] sm:$0xff]  }
 0x13c   :  { %1188 = vmatprep.subr.bf16.mxu0 %v1837_v51 }
 0x13e   :  { %1662 = vmatpush3.bf16.msra.mxu1 %v1874_v37 }
 0x13f   :  { %1189 = vmatpush1.bf16.msra.mxu0 %v1835_v53  ;;  %1663 = vmatprep.subr.bf16.mxu1 %v1875_v15 }
 0x140   :  { %1190 = vmatprep.subr.bf16.mxu0 %v1840_v57 }
 0x141   :  { %1590 = vmatmul.mubr.msk.bf16.gmra.mxu1 %vm2191_vm9, %v1589_v60 }
 0x142   :  { %1664 = vmatpush3.bf16.msra.mxu1 %v1876_v38 }
 0x143   :  { %1191 = vmatpush1.bf16.msra.mxu0 %v1838_v61  ;;  %1665 = vmatprep.subr.bf16.mxu1 %v1877_v39 }
 0x144   :  { %1192 = vmatprep.subr.bf16.mxu0 %v1843_v62 }
 0x146   :  { %1666 = vmatpush3.bf16.msra.mxu1 %v1878_v40 }
 0x147   :  { %1193 = vmatpush1.bf16.msra.mxu0 %v1841_v63  ;;  %1667 = vmatprep.subr.bf16.mxu1 %v1879_v41  ;;  %v1247_v63 = vsub.s32 5, %v2100_v28 }
 0x148   :  { %1194 = vmatprep.subr.bf16.mxu0 %v1846_v0  ;;  %v1243_v0 = vsub.s32 1, %v2100_v28 }
 0x14a   :  { %1668 = vmatpush3.bf16.msra.mxu1 %v1880_v42 }
 0x14b   :  { %1195 = vmatpush1.bf16.msra.mxu0 %v1844_v1  ;;  %1669 = vmatprep.subr.bf16.mxu1 %v1881_v43 }
 0x14c   :  { %1196 = vmatprep.subr.bf16.mxu0 %v1849_v2 }
 0x14e   :  { %1670 = vmatpush3.bf16.msra.mxu1 %v1882_v44 }
 0x14f   :  { %1197 = vmatpush2.bf16.msra.mxu0 %v1847_v3  ;;  %1671 = vmatprep.subr.bf16.mxu1 %v1883_v45  ;;  %v1248_v3 = vrot.slane %v2107_v34, %v1247_v63 }
 0x150   :  { %1198 = vmatprep.subr.bf16.mxu0 %v1852_v5 }
 0x152   :  { %1672 = vmatpush3.bf16.msra.mxu1 %v1884_v46 }
 0x153   :  { %1199 = vmatpush2.bf16.msra.mxu0 %v1850_v6  ;;  %1673 = vmatprep.subr.bf16.mxu1 %v1885_v47  ;;  %v1244_v6 = vrot.slane %v2107_v34, %v1243_v0 }
 0x154   :  { %1200 = vmatprep.subr.bf16.mxu0 %v1855_v7 }
 0x156   :  { %1674 = vmatpush3.bf16.msra.mxu1 %v1886_v48 }
 0x157   :  { %1201 = vmatpush2.bf16.msra.mxu0 %v1853_v8 }
 0x158   :  { %1202 = vmatprep.subr.bf16.mxu0 %v1858_v9 }
 0x15b   :  { %1203 = vmatpush2.bf16.msra.mxu0 %v1856_v10 }
 0x15c   :  { %1204 = vmatprep.subr.bf16.mxu0 %v1861_v12 }
 0x15f   :  { %1205 = vmatpush2.bf16.msra.mxu0 %v1859_v13 }
 0x160   :  { %1206 = vmatprep.subr.bf16.mxu0 %v1864_v14  ;;  %v1258_v14 = vrot.slane %v1248_v3, %v1243_v0 }
 0x163   :  { %1207 = vmatpush2.bf16.msra.mxu0 %v1862_v16 }
 0x164   :  { %1208 = vmatprep.subr.bf16.mxu0 %v1867_v17  ;;  %v1254_v17 = vrot.slane %v1244_v6, %v1243_v0 }
 0x167   :  { %1209 = vmatpush2.bf16.msra.mxu0 %v1865_v20 }
 0x168   :  { %1210 = vmatprep.subr.bf16.mxu0 %v1870_v21 }
 0x16b   :  { %1211 = vmatpush2.bf16.msra.mxu0 %v1868_v29 }
 0x16e   :  { %1630 = vmatmul.mubr.msk.bf16.vlgmr.msra.gmra.mxu0 %vm2173_vm6, %v1629_v27 }
 0x16f   :  { %1634 = vmatprep.mubr.msk.bf16.mxu0 %vm1632_vm11, %v1633_v33 }
 0x176   :  { %1638 = vmatmul.mubr.msk.bf16.gmra.mxu0 %vm1632_vm11, %v1637_v11 }
 0x1ee   :  { %v755_v49 = vpop.f32.mrf.mxu0 }
 0x1f0   :  { %v757_v50 = vpop.f32.mrf.mxu0 }
 0x1f2   :  { %v759_v51 = vpop.f32.mrf.mxu0 }
 0x1f4   :  { %v761_v52 = vpop.f32.mrf.mxu0 }
 0x1f6   :  { %v765_v55 = vpop.f32.mrf.mxu0 }
 0x1f8   :  { %v767_v58 = vpop.f32.mrf.mxu0 }
 0x1f9   :  { %v968_v53 = vpop.f32.mrf.mxu1 }
 0x1fa   :  { %v769_v61 = vpop.f32.mrf.mxu0  ;;  %v969_v8 = vadd.f32 %v968_v53, %v755_v49  ;;  %v1313_v53 = vsub.s32 2, %v2100_v28 }
 0x1fb   :  { %v970_v57 = vpop.f32.mrf.mxu1 }
 0x1fc   :  { %v771_v1 = vpop.f32.mrf.mxu0  ;;  %v971_v7 = vadd.f32 %v970_v57, %v757_v50  ;;  %v1314_v57 = vrot.slane %v2107_v34, %v1313_v53 }
 0x1fd   :  { %v972_v60 = vpop.f32.mrf.mxu1 }
 0x1fe   :  { %v973_v12 = vadd.f32 %v972_v60, %v759_v51 }
 0x1ff   :  { %v974_v62 = vpop.f32.mrf.mxu1 }
 0x200   :  { %v975_v20 = vadd.f32 %v974_v62, %v761_v52 }
 0x201   :  { %v978_v2 = vpop.f32.mrf.mxu1 }
 0x202   :  { %v979_v54 = vadd.f32 %v978_v2, %v765_v55 }
 0x203   :  { %v980_v9 = vpop.f32.mrf.mxu1 }
 0x204   :  { %v981_v32 = vadd.f32 %v980_v9, %v767_v58 }
 0x205   :  { %v982_v22 = vpop.f32.mrf.mxu1 }
 0x206   :  { %v983_v56 = vadd.f32 %v982_v22, %v769_v61 }
 0x207   :  { %v984_v27 = vpop.f32.mrf.mxu1 }
 0x208   :  { %v985_v15 = vadd.f32 %v984_v27, %v771_v1 }
 0x22e   :  { %v1214_v5 = vpop.f32.mrf.mxu0 }
 0x22f   :  { %v1233_v16 = vadd.f32 %v1214_v5, %v969_v8 }
 0x230   :  { %v1216_v10 = vpop.f32.mrf.mxu0 }
 0x231   :  { %v1234_v13 = vadd.f32 %v1216_v10, %v971_v7  ;;  %v1259_v30 = vadd.f32 %v1254_v17, %v1233_v16 }
 0x232   :  { %v1218_v18 = vpop.f32.mrf.mxu0 }
 0x233   :  { %v1235_v21 = vadd.f32 %v1218_v18, %v973_v12  ;;  %v1260_v25 = vadd.f32 %v1258_v14, %v1234_v13  ;;  %v1267_v35 = vmax.f32 %v1259_v30, 0.0 }
 0x234   :  { %v1220_v23 = vpop.f32.mrf.mxu0 }
 0x235   :  { %v1261_v26 = vadd.f32 %v1254_v17, %v1235_v21  ;;  %v1236_v29 = vadd.f32 %v1220_v23, %v975_v20  ;;  %v1268_v4 = vmax.f32 %v1260_v25, 0.0 }
 0x236   :  { %v1224_v31 = vpop.f32.mrf.mxu0 }
 0x237   :  { %v1262_v19 = vadd.f32 %v1258_v14, %v1236_v29  ;;  %v1269_v59 = vmax.f32 %v1261_v26, 0.0  ;;  %v1237_v36 = vadd.f32 %v1224_v31, %v979_v54 }
 0x238   :  { %v1226_v33 = vpop.f32.mrf.mxu0 }
 0x239   :  { %v1270_v11 = vmax.f32 %v1262_v19, 0.0  ;;  %v1238_v24 = vadd.f32 %v1226_v33, %v981_v32  ;;  %v1275_v40 = vpack.c.bf16 %v1269_v59, %v1267_v35  ;;  %v1263_v45 = vadd.f32 %v1254_v17, %v1237_v36 }
 0x23a   :  { %v1228_v37 = vpop.f32.mrf.mxu0 }
 0x23b   :  { %v1239_v38 = vadd.f32 %v1228_v37, %v983_v56  ;;  %v1276_v39 = vpack.c.bf16 %v1270_v11, %v1268_v4  ;;  %v1264_v42 = vadd.f32 %v1258_v14, %v1238_v24  ;;  %v1271_v50 = vmax.f32 %v1263_v45, 0.0 }
 0x23c   :  { %v1230_v41 = vpop.f32.mrf.mxu0 }
 0x23d   :  { %v1265_v43 = vadd.f32 %v1254_v17, %v1239_v38  ;;  %v1240_v44 = vadd.f32 %v1230_v41, %v985_v15  ;;  %1443 = vmatprep.mubr.bf16.mxu1 %v1276_v39  ;;  %v1272_v48 = vmax.f32 %v1264_v42, 0.0 }
 0x23e   :  { %1444 = vmatmul.mubr.bf16.vlgmr.msra.gmra.mxu1 %v1275_v40 }
 0x23f   :  { %v1266_v46 = vadd.f32 %v1258_v14, %v1240_v44  ;;  %v1273_v47 = vmax.f32 %v1265_v43, 0.0 }
 0x241   :  { %v1274_v49 = vmax.f32 %v1266_v46, 0.0  ;;  %v1277_v52 = vpack.c.bf16 %v1273_v47, %v1271_v50 }
 0x243   :  { %v1278_v51 = vpack.c.bf16 %v1274_v49, %v1272_v48 }
 0x245   :  { %1451 = vmatprep.mubr.bf16.mxu1 %v1278_v51 }
 0x246   :  { %1452 = vmatmul.mubr.bf16.gmra.mxu1 %v1277_v52 }
 0x2fe   :  { %v1675_v55 = vpop.f32.mrf.mxu1 }
 0x300   :  { %v1676_v58 = vpop.f32.mrf.mxu1 }
 0x301   :  { %v1677_v60 = vadd.f32 %v1676_v58, %v1675_v55 }
 0x302   :  { %v1678_v61 = vpop.f32.mrf.mxu1 }
 0x303   :  { %v1446_v62 = vadd.f32 %v1677_v60, %v1314_v57 }
 0x304   :  { %v1679_v63 = vpop.f32.mrf.mxu1 }
 0x305   :  { %v1460_v0 = vmax.f32 %v1446_v62, 0.0  ;;  %v1680_v1 = vadd.f32 %v1679_v63, %v1678_v61 }
 0x306   :  { %v1681_v2 = vpop.f32.mrf.mxu1 }
 0x307   :  { %1464 = vst [vmem:[#allocation11] sm:$0xff] %v1460_v0  ;;  %v1449_v3 = vadd.f32 %v1680_v1, %v1314_v57 }
 0x308   :  { %v1682_v5 = vpop.f32.mrf.mxu1 }
 0x309   :  { %v1461_v6 = vmax.f32 %v1449_v3, 0.0  ;;  %v1683_v7 = vadd.f32 %v1682_v5, %v1681_v2 }
 0x30a   :  { %v1684_v8 = vpop.f32.mrf.mxu1 }
 0x30b   :  { %1465 = vst [vmem:[#allocation11 + $0x8] sm:$0xff] %v1461_v6  ;;  %v1454_v9 = vadd.f32 %v1683_v7, %v1314_v57 }
 0x30c   :  { %v1685_v28 = vpop.f32.mrf.mxu1 }
 0x30d   :  { %v1462_v10 = vmax.f32 %v1454_v9, 0.0  ;;  %v1686_v12 = vadd.f32 %v1685_v28, %v1684_v8 }
 0x30f   :  { %1466 = vst [vmem:[#allocation11 + $0x10] sm:$0xff] %v1462_v10  ;;  %v1457_v34 = vadd.f32 %v1686_v12, %v1314_v57 }
 0x311   :  { %v1463_v13 = vmax.f32 %v1457_v34, 0.0 }
 0x313   :  { %1467 = vst [vmem:[#allocation11 + $0x18] sm:$0xff] %v1463_v13 }
 0x314   :  { %1998 = shalt.err (!%p1995_p1)
}
 0x315   :  { %1479 = dma.vmem_to_hbm [thread:$0]  %s1474_s23, 512, %s2247_s6, [#allocation4], %s2020_s9, %s2020_s9, %s2021_s10  }
 0x316   :  { %2013 = dma.done.wait [#allocation4], 512  }
 0x317   :  { %2014 = vsyncadd [#allocation4], 4294966784 }
 0x318   :  { %1483 = vsyncpa [#allocation3], 1 }
 0x319   :  { %1484 = vsyncpa [#allocation6], 1 }
 0x31a   :  { %1485 = vsyncpa [#allocation9], 1 }
 0x31b   :  { %1486 = vsyncpa [#allocation4], 1 }

</bundles_post_ra>
